<compile_context>
chip_gen: v7x
topology: tpu7x:2x2x1
jax: 0.10.0
libtpu: 0.0.40
codegen_flags: <defaults>
</compile_context>

<pallas_src>
import functools

import jax
import jax.numpy as jnp
from jax import lax
from jax.experimental import pallas as pl
from jax.experimental.pallas import tpu as pltpu


def _round_up(x, m):
    return (x + m - 1) // m * m


# -----------------------------------------------------------------------------
# Fused unary-cost + ICM-sweep kernel (one grid step == one N-tile)
# -----------------------------------------------------------------------------
def icm_kernel(order_ref, x_ref, ct_ref, cu_ref, cp_ref, onehot0_ref, kdec_ref,
               b_ref, cost_ref, onehot_ref, *, icm_iter):
    M, MKp, Kp = cp_ref.shape
    TN = x_ref.shape[0]

    # Fused unary cost for this tile: -2 * X @ C^T + C_unary.
    # Padded lanes (k >= K) carry +inf via the pre-padded C_unary -> never win argmin.
    cost_ref[...] = (
        -2.0 * jnp.dot(x_ref[...], ct_ref[...], preferred_element_type=jnp.float32)
        + cu_ref[...]
    )
    onehot_ref[...] = onehot0_ref[...]

    kio = lax.broadcasted_iota(jnp.int32, (TN, Kp), 1)        # lane index 0..Kp-1

    def step(t, carry):
        i = order_ref[t % M]                                  # codebook to update (SMEM)
        off = pl.multiple_of(i * Kp, 128)                     # 128-aligned lane offset
        cp_i = cp_ref[i]                                      # (M*Kp, Kp) dyn. leading load
        # pairwise cost: sum_j C_pair[i, j, :, B[:, j]]  (includes j == i, as in torch)
        pair = jnp.dot(onehot_ref[...], cp_i, preferred_element_type=jnp.float32)
        c = cost_ref[:, pl.ds(off, Kp)] + pair                # (TN, Kp)
        vmin = jnp.min(c, axis=1, keepdims=True)
        # first-occurrence argmin (torch.argmin convention)
        idx = jnp.min(jnp.where(c == vmin, kio, Kp), axis=1, keepdims=True)
        # rewrite ONLY the i-th Kp-wide one-hot slab
        onehot_ref[:, pl.ds(off, Kp)] = (kio == idx).astype(jnp.float32)
        return carry

    lax.fori_loop(0, icm_iter * M, step, 0)

    # decode codes: B[n, j] = k such that onehot[n, j*Kp + k] == 1   (exact in f32)
    b_f = jnp.dot(onehot_ref[...], kdec_ref[...], preferred_element_type=jnp.float32)
    b_ref[...] = (b_f + 0.5).astype(jnp.int32)


# -----------------------------------------------------------------------------
# Module wrapper (mirrors the PyTorch ICM module forward)
# -----------------------------------------------------------------------------
class ICMPallas:
    def __init__(self, M, K, icm_iter, randord, npert, batch):
        self.icm_iter = icm_iter
        self.randord = randord
        self.npert = npert
        self._m = M
        self._k = K
        self._n = batch
        self.C = None  # codebooks (M*K, D), set externally like the torch module

    def forward(self, X, B, C_unary, C_pair, *, key):
        n, M, K = self._n, self._m, self._k
        D = X.shape[1]
        Kp = _round_up(max(K, 128), 128)
        MKp = M * Kp

        # --- perturbation (torch.multinomial over ones + randint) ---
        # TODO(synk): randomness (multinomial / randint / permutation) stays in JAX glue,
        #             not inside the Pallas kernel.
        if self.npert > 0:
            kp_, kv_, key = jax.random.split(key, 3)
            pertidx = jax.vmap(lambda k_: jax.random.permutation(k_, M)[: self.npert])(
                jax.random.split(kp_, n)
            )
            pertvals = jax.random.randint(kv_, (n, self.npert), 0, K, dtype=B.dtype)
            B = B.at[jnp.arange(n)[:, None], pertidx].set(pertvals)

        # --- visiting order (np.random.permutation equivalent) ---
        if self.randord:
            ko, key = jax.random.split(key)
            order = jax.random.permutation(ko, M).astype(jnp.int32)
        else:
            order = jnp.arange(M, dtype=jnp.int32)

        # --- glue: lane-pad K -> Kp and reorder C_pair (pure layout, no HBM round trips
        #     of the big (N, M*K) cost matrix anymore) ---
        ct_pad = (jnp.pad(self.C.reshape(M, K, D), ((0, 0), (0, Kp - K), (0, 0)))
                  .reshape(MKp, D).T)                                         # (D, M*Kp)
        cu_pad = jnp.pad(C_unary.reshape(n, M, K), ((0, 0), (0, 0), (0, Kp - K)),
                         constant_values=jnp.inf).reshape(n, MKp)             # (N, M*Kp)
        # cp_pad[i, j*Kp + k', k] = C_pair[i, j, k, k']
        cp_pad = jnp.pad(jnp.transpose(C_pair, (0, 1, 3, 2)),
                         ((0, 0), (0, 0), (0, Kp - K), (0, Kp - K))
                         ).reshape(M, MKp, Kp)                                # (M, M*Kp, Kp)
        onehot0 = jax.nn.one_hot(B, Kp, dtype=jnp.float32).reshape(n, MKp)
        rows = jnp.arange(MKp)
        kdec = jnp.where(rows[:, None] // Kp == jnp.arange(M)[None, :],
                         (rows % Kp)[:, None], 0).astype(jnp.float32)         # (M*Kp, M)

        # --- N tiling ---
        TN = 256 if n >= 256 else _round_up(n, 8)
        n_pad = _round_up(n, TN)
        if n_pad != n:
            X = jnp.pad(X, ((0, n_pad - n), (0, 0)))
            cu_pad = jnp.pad(cu_pad, ((0, n_pad - n), (0, 0)))
            onehot0 = jnp.pad(onehot0, ((0, n_pad - n), (0, 0)))
        num_tiles = n_pad // TN

        # --- explicit VMEM budget + advisory cost estimate ---
        tile_b = 8 * (TN * D + 2 * TN * MKp + TN * M)            # double-buffered tiles
        res_b = 8 * (D * MKp + M * MKp * Kp + MKp * M)           # resident blocks
        scr_b = 8 * TN * MKp                                     # two f32 scratch buffers
        vmem_limit = int(min(100 * 2**20, max(32 * 2**20, 1.5 * (tile_b + res_b + scr_b))))
        flops = (2 * n_pad * D * MKp
                 + self.icm_iter * M * 2 * n_pad * MKp * Kp
                 + 2 * n_pad * MKp * M)
        bytes_acc = 4 * (n_pad * D + D * MKp + n_pad * MKp + M * MKp * Kp
                         + n_pad * MKp + MKp * M + n_pad * M)

        grid_spec = pltpu.PrefetchScalarGridSpec(
            num_scalar_prefetch=1,                                # `order` -> SMEM
            grid=(num_tiles,),
            in_specs=[
                pl.BlockSpec((TN, D), lambda b, order: (b, 0)),          # X tile
                pl.BlockSpec((D, MKp), lambda b, order: (0, 0)),         # C^T (resident)
                pl.BlockSpec((TN, MKp), lambda b, order: (b, 0)),        # C_unary tile
                pl.BlockSpec((M, MKp, Kp), lambda b, order: (0, 0, 0)),  # C_pair (resident)
                pl.BlockSpec((TN, MKp), lambda b, order: (b, 0)),        # initial one-hot
                pl.BlockSpec((MKp, M), lambda b, order: (0, 0)),         # decode (resident)
            ],
            out_specs=pl.BlockSpec((TN, M), lambda b, order: (b, 0)),
            scratch_shapes=[
                pltpu.VMEM((TN, MKp), jnp.float32),   # fused unary cost
                pltpu.VMEM((TN, MKp), jnp.float32),   # one-hot ICM state
            ],
        )

        b_out = pl.pallas_call(
            functools.partial(icm_kernel, icm_iter=self.icm_iter),
            out_shape=jax.ShapeDtypeStruct((n_pad, M), jnp.int32),
            grid_spec=grid_spec,
            compiler_params=pltpu.CompilerParams(
                dimension_semantics=("parallel",),
                vmem_limit_bytes=vmem_limit,
            ),
            cost_estimate=pl.CostEstimate(flops=int(flops), transcendentals=0,
                                          bytes_accessed=int(bytes_acc)),
        )(order, X, ct_pad, cu_pad, cp_pad, onehot0, kdec)
        return b_out[:n]


if __name__ == "__main__":
    M, K, D, n = 4, 8, 16, 8
    icm_iter, randord, npert = 2, True, 2

    key = jax.random.PRNGKey(0)
    kx, kc, kb, ku, kpair, kfwd = jax.random.split(key, 6)
    X = jax.random.normal(kx, (n, D), jnp.float32)
    C = jax.random.normal(kc, (M * K, D), jnp.float32)           # self.C in torch module
    B0 = jax.random.randint(kb, (n, M), 0, K, dtype=jnp.int32)
    C_unary = jax.random.normal(ku, (n, M * K), jnp.float32)
    C_pair = jax.random.normal(kpair, (M, M, K, K), jnp.float32)

    icm = ICMPallas(M, K, icm_iter, randord, npert, batch=n)
    icm.C = C

    B = icm.forward(X, B0, C_unary, C_pair, key=kfwd)
    B = jax.block_until_ready(B)

    assert B.shape == (n, M) and B.dtype == jnp.int32
    assert bool(jnp.all((B >= 0) & (B < K)))
    print("KERNEL_OK")
</pallas_src>

<mosaic_0001>
module attributes {stable_mosaic.version = 11 : i64} {
  func.func @icm_kernel(%arg0: i32, %arg1: memref<4xi32, #tpu.memory_space<smem>>, %arg2: memref<8x16xf32, #tpu.memory_space<vmem>>, %arg3: memref<16x512xf32, #tpu.memory_space<vmem>>, %arg4: memref<8x512xf32, #tpu.memory_space<vmem>>, %arg5: memref<4x512x128xf32, #tpu.memory_space<vmem>>, %arg6: memref<8x512xf32, #tpu.memory_space<vmem>>, %arg7: memref<512x4xf32, #tpu.memory_space<vmem>>, %arg8: memref<8x4xi32, #tpu.memory_space<vmem>>, %arg9: memref<8x512xf32, #tpu.memory_space<vmem>>, %arg10: memref<8x512xf32, #tpu.memory_space<vmem>>) attributes {dimension_semantics = [#tpu.dimension_semantics<parallel>], iteration_bounds = array<i64: 1>, scalar_prefetch = 1 : i64, scratch_operands = 2 : i64, tpu.core_type = #tpu.core_type<tc>, window_params = [{transform_indices = @transform_0, window_bounds = array<i64: 8, 16>}, {pipeline_mode = #tpu.pipeline_mode<synchronous>, transform_indices = @transform_1, window_bounds = array<i64: 16, 512>}, {transform_indices = @transform_2, window_bounds = array<i64: 8, 512>}, {pipeline_mode = #tpu.pipeline_mode<synchronous>, transform_indices = @transform_3, window_bounds = array<i64: 4, 512, 128>}, {transform_indices = @transform_4, window_bounds = array<i64: 8, 512>}, {pipeline_mode = #tpu.pipeline_mode<synchronous>, transform_indices = @transform_5, window_bounds = array<i64: 512, 4>}, {transform_indices = @transform_6, window_bounds = array<i64: 8, 4>}]} {
    %c0 = arith.constant 0 : index
    %c0_0 = arith.constant 0 : index
    %0 = vector.load %arg2[%c0, %c0_0] : memref<8x16xf32, #tpu.memory_space<vmem>>, vector<8x16xf32>
    %c0_1 = arith.constant 0 : index
    %c0_2 = arith.constant 0 : index
    %1 = vector.load %arg3[%c0_1, %c0_2] : memref<16x512xf32, #tpu.memory_space<vmem>>, vector<16x512xf32>
    %cst = arith.constant dense<0.000000e+00> : vector<8x512xf32>
    %2 = tpu.matmul %0, %1, %cst {dimension_numbers = #tpu.dot_dimension_numbers<[1], [0], [0], [1], [0, 0, 1, 1], [], []>} : vector<8x16xf32>, vector<16x512xf32>, vector<8x512xf32> -> vector<8x512xf32>
    %cst_3 = arith.constant -2.000000e+00 : f32
    %3 = vector.broadcast %cst_3 : f32 to vector<8x512xf32>
    %4 = arith.mulf %3, %2 : vector<8x512xf32>
    %c0_4 = arith.constant 0 : index
    %c0_5 = arith.constant 0 : index
    %5 = vector.load %arg4[%c0_4, %c0_5] : memref<8x512xf32, #tpu.memory_space<vmem>>, vector<8x512xf32>
    %6 = arith.addf %4, %5 : vector<8x512xf32>
    %c0_6 = arith.constant 0 : index
    %c0_7 = arith.constant 0 : index
    %7 = vector.load %arg9[%c0_6, %c0_7] : memref<8x512xf32, #tpu.memory_space<vmem>>, vector<8x512xf32>
    tpu.vector_store %arg9[%c0_6, %c0_7], %6 {strides = array<i32>} : memref<8x512xf32, #tpu.memory_space<vmem>>, vector<8x512xf32>,
    %c0_8 = arith.constant 0 : index
    %c0_9 = arith.constant 0 : index
    %8 = vector.load %arg6[%c0_8, %c0_9] : memref<8x512xf32, #tpu.memory_space<vmem>>, vector<8x512xf32>
    %c0_10 = arith.constant 0 : index
    %c0_11 = arith.constant 0 : index
    %9 = vector.load %arg10[%c0_10, %c0_11] : memref<8x512xf32, #tpu.memory_space<vmem>>, vector<8x512xf32>
    tpu.vector_store %arg10[%c0_10, %c0_11], %8 {strides = array<i32>} : memref<8x512xf32, #tpu.memory_space<vmem>>, vector<8x512xf32>,
    %10 = tpu.iota {dimensions = array<i32: 1>} : vector<8x128xi32>
    %c0_i32 = arith.constant 0 : i32
    %c8_i32 = arith.constant 8 : i32
    %11 = arith.addi %c0_i32, %c8_i32 : i32
    %c1_i32 = arith.constant 1 : i32
    scf.for %arg11 = %c0_i32 to %11 step %c1_i32  : i32 {
      %c4_i32 = arith.constant 4 : i32
      %c0_i32_21 = arith.constant 0 : i32
      %19 = arith.cmpi eq, %c4_i32, %c0_i32_21 : i32
      %c1_i32_22 = arith.constant 1 : i32
      %20 = arith.select %19, %c1_i32_22, %c4_i32 : i32
      %21 = arith.remsi %arg11, %20 : i32
      %c0_i32_23 = arith.constant 0 : i32
      %22 = arith.cmpi ne, %21, %c0_i32_23 : i32
      %c0_i32_24 = arith.constant 0 : i32
      %23 = arith.cmpi slt, %21, %c0_i32_24 : i32
      %c0_i32_25 = arith.constant 0 : i32
      %24 = arith.cmpi slt, %20, %c0_i32_25 : i32
      %25 = arith.xori %23, %24 : i1
      %26 = arith.andi %25, %22 : i1
      %27 = arith.addi %21, %20 : i32
      %28 = arith.select %26, %27, %21 : i32
      %29 = arith.index_cast %28 : i32 to index
      %30 = memref.load %arg1[%29] : memref<4xi32, #tpu.memory_space<smem>>
      %c128_i32 = arith.constant 128 : i32
      %31 = arith.muli %30, %c128_i32 : i32
      %32 = tpu.assume_multiple %31, 128 : i32
      %33 = arith.index_cast %30 : i32 to index
      %c0_26 = arith.constant 0 : index
      %c0_27 = arith.constant 0 : index
      %34 = vector.load %arg5[%33, %c0_26, %c0_27] : memref<4x512x128xf32, #tpu.memory_space<vmem>>, vector<1x512x128xf32>
      %35 = vector.shape_cast %34 : vector<1x512x128xf32> to vector<512x128xf32>
      %c0_28 = arith.constant 0 : index
      %c0_29 = arith.constant 0 : index
      %36 = vector.load %arg10[%c0_28, %c0_29] : memref<8x512xf32, #tpu.memory_space<vmem>>, vector<8x512xf32>
      %cst_30 = arith.constant dense<0.000000e+00> : vector<8x128xf32>
      %37 = tpu.matmul %36, %35, %cst_30 {dimension_numbers = #tpu.dot_dimension_numbers<[1], [0], [0], [1], [0, 0, 1, 1], [], []>} : vector<8x512xf32>, vector<512x128xf32>, vector<8x128xf32> -> vector<8x128xf32>
      %c0_31 = arith.constant 0 : index
      %38 = arith.index_cast %32 : i32 to index
      %39 = vector.load %arg9[%c0_31, %38] : memref<8x512xf32, #tpu.memory_space<vmem>>, vector<8x128xf32>
      %40 = arith.addf %39, %37 : vector<8x128xf32>
      %cst_32 = arith.constant dense<0x7F800000> : vector<8xf32>
      %41 = vector.multi_reduction <minimumf>, %40, %cst_32 [1] : vector<8x128xf32> to vector<8xf32>
      %42 = vector.shape_cast %41 : vector<8xf32> to vector<8x1xf32>
      %43 = vector.broadcast %42 : vector<8x1xf32> to vector<8x128xf32>
      %44 = arith.cmpf oeq, %40, %43 : vector<8x128xf32>
      %c128_i32_33 = arith.constant 128 : i32
      %45 = vector.broadcast %c128_i32_33 : i32 to vector<8x128xi32>
      %46 = arith.select %44, %10, %45 : vector<8x128xi1>, vector<8x128xi32>
      %cst_34 = arith.constant dense<2147483647> : vector<8xi32>
      %47 = vector.multi_reduction <minsi>, %46, %cst_34 [1] : vector<8x128xi32> to vector<8xi32>
      %48 = vector.shape_cast %47 : vector<8xi32> to vector<8x1xi32>
      %49 = vector.broadcast %48 : vector<8x1xi32> to vector<8x128xi32>
      %50 = arith.cmpi eq, %10, %49 : vector<8x128xi32>
      %51 = arith.extui %50 : vector<8x128xi1> to vector<8x128xi32>
      %52 = arith.sitofp %51 : vector<8x128xi32> to vector<8x128xf32>
      %c0_35 = arith.constant 0 : index
      %53 = arith.index_cast %32 : i32 to index
      %54 = vector.load %arg10[%c0_35, %53] : memref<8x512xf32, #tpu.memory_space<vmem>>, vector<8x128xf32>
      tpu.vector_store %arg10[%c0_35, %53], %52 {strides = array<i32>} : memref<8x512xf32, #tpu.memory_space<vmem>>, vector<8x128xf32>,
    }
    %c8_i32_12 = arith.constant 8 : i32
    %c0_13 = arith.constant 0 : index
    %c0_14 = arith.constant 0 : index
    %12 = vector.load %arg10[%c0_13, %c0_14] : memref<8x512xf32, #tpu.memory_space<vmem>>, vector<8x512xf32>
    %c0_15 = arith.constant 0 : index
    %c0_16 = arith.constant 0 : index
    %13 = vector.load %arg7[%c0_15, %c0_16] : memref<512x4xf32, #tpu.memory_space<vmem>>, vector<512x4xf32>
    %cst_17 = arith.constant dense<0.000000e+00> : vector<8x4xf32>
    %14 = tpu.matmul %12, %13, %cst_17 {dimension_numbers = #tpu.dot_dimension_numbers<[1], [0], [0], [1], [0, 0, 1, 1], [], []>} : vector<8x512xf32>, vector<512x4xf32>, vector<8x4xf32> -> vector<8x4xf32>
    %cst_18 = arith.constant 5.000000e-01 : f32
    %15 = vector.broadcast %cst_18 : f32 to vector<8x4xf32>
    %16 = arith.addf %14, %15 : vector<8x4xf32>
    %17 = arith.fptosi %16 : vector<8x4xf32> to vector<8x4xi32>
    %c0_19 = arith.constant 0 : index
    %c0_20 = arith.constant 0 : index
    %18 = vector.load %arg8[%c0_19, %c0_20] : memref<8x4xi32, #tpu.memory_space<vmem>>, vector<8x4xi32>
    tpu.vector_store %arg8[%c0_19, %c0_20], %17 {strides = array<i32>} : memref<8x4xi32, #tpu.memory_space<vmem>>, vector<8x4xi32>,
    return
  }
  func.func @transform_0(%arg0: i32, %arg1: memref<4xi32, #tpu.memory_space<smem>>) -> (i32, i32) {
    %c0_i32 = arith.constant 0 : i32
    %c0_i32_0 = arith.constant 0 : i32
    return %arg0, %c0_i32 : i32, i32
  }
  func.func @transform_1(%arg0: i32, %arg1: memref<4xi32, #tpu.memory_space<smem>>) -> (i32, i32) {
    %c0_i32 = arith.constant 0 : i32
    %c0_i32_0 = arith.constant 0 : i32
    %c0_i32_1 = arith.constant 0 : i32
    return %c0_i32, %c0_i32_0 : i32, i32
  }
  func.func @transform_2(%arg0: i32, %arg1: memref<4xi32, #tpu.memory_space<smem>>) -> (i32, i32) {
    %c0_i32 = arith.constant 0 : i32
    %c0_i32_0 = arith.constant 0 : i32
    return %arg0, %c0_i32 : i32, i32
  }
  func.func @transform_3(%arg0: i32, %arg1: memref<4xi32, #tpu.memory_space<smem>>) -> (i32, i32, i32) {
    %c0_i32 = arith.constant 0 : i32
    %c0_i32_0 = arith.constant 0 : i32
    %c0_i32_1 = arith.constant 0 : i32
    %c0_i32_2 = arith.constant 0 : i32
    return %c0_i32, %c0_i32_0, %c0_i32_1 : i32, i32, i32
  }
  func.func @transform_4(%arg0: i32, %arg1: memref<4xi32, #tpu.memory_space<smem>>) -> (i32, i32) {
    %c0_i32 = arith.constant 0 : i32
    %c0_i32_0 = arith.constant 0 : i32
    return %arg0, %c0_i32 : i32, i32
  }
  func.func @transform_5(%arg0: i32, %arg1: memref<4xi32, #tpu.memory_space<smem>>) -> (i32, i32) {
    %c0_i32 = arith.constant 0 : i32
    %c0_i32_0 = arith.constant 0 : i32
    %c0_i32_1 = arith.constant 0 : i32
    return %c0_i32, %c0_i32_0 : i32, i32
  }
  func.func @transform_6(%arg0: i32, %arg1: memref<4xi32, #tpu.memory_space<smem>>) -> (i32, i32) {
    %c0_i32 = arith.constant 0 : i32
    %c0_i32_0 = arith.constant 0 : i32
    return %arg0, %c0_i32 : i32, i32
  }
}

</mosaic_0001>

<bundles_post_ra>
// kernel: tpu_custom_call.1
= control target key start
LH: loop header
LB: loop body
LE: loop exit
PB: predicated region body
PF: predicated region fallthrough
CT: control target
= control target key end

     0   :  { %s1459_s0 = inlined_call_operand.vmem [shape: s32[4], index: 0, kind: input, shape index: {}]   ;;  %s1460_s1 = inlined_call_operand.vmem [shape: f32[8,16], index: 1, kind: input, shape index: {}]   ;;  %s1461_s2 = inlined_call_operand.vmem [shape: f32[16,512], index: 2, kind: input, shape index: {}]   ;;  %s1462_s3 = inlined_call_operand.vmem [shape: f32[8,512], index: 3, kind: input, shape index: {}]   ;;  %s1463_s4 = inlined_call_operand.hbm [shape: f32[4,512,128], index: 4, kind: input, shape index: {}]   ;;  %s1464_s5 = inlined_call_operand.vmem [shape: f32[8,512], index: 5, kind: input, shape index: {}]   ;;  %s1465_s6 = inlined_call_operand.vmem [shape: f32[512,4], index: 6, kind: input, shape index: {}]   ;;  %s1466_s7 = inlined_call_operand.vmem [shape: s32[8,4], index: 7, kind: output, shape index: {}]  }
   0x1   :  { %s12_s26 = sshll.u32 %s1459_s0, 4  ;;  %s13_s26 = int_to_ptr.vmem [resolvable:$true] %s12_s26 }
   0x2   :  { %s1014_s27 = scalar_lea.vmem %s13_s26, 16  ;;  %p1019_p1 = scmp.lt.s32.totalorder %s13_s26, %s13_s26 }
   0x3   :  { %p1015_p0 = scmp.ne.s32.totalorder %s13_s26, %s1014_s27  ;;  %p1020_p2 = scmp.lt.s32.totalorder %s1014_s27, %s1014_s27 }
   0x5   :  { %p1021_p3 = por %p1020_p2, %p1019_p1 }
   0x7   :  { %p1022_p4 = pnand %p1021_p3, %p1015_p0 }
   0x9   :  { %1025 = shalt.err (!%p1022_p4)  }
   0xa   :  { %s1060_s28 = smov [#allocation5]  }
   0xb   :  { %15 = dma.vmem_to_smem %s13_s26, 16, %s1060_s28, [#allocation4] }
   0xc   :  { %1052 = dma.done.wait [#allocation4], 16 }
   0xd   :  { %1053 = vsyncadd [#allocation4], 4294967280 }
   0xe   :  { %17 = sfence }
   0xf   :  { %18 = vsyncpa [#allocation7], 0  ;;  %s1061_s29 = smov [#allocation6]   ;;  %s1026_s0 = scalar_lea.hbm %s1463_s4, 32768 }
  0x10   :  { %s30_s30 = sshll.u32 %s1061_s29, 4  ;;  %p1027_p5 = scmp.ne.s32.totalorder %s1463_s4, %s1026_s0  ;;  %s31_s30 = int_to_ptr.vmem [resolvable:$true] %s30_s30 }
  0x11   :  { %p1030_p6 = scmp.lt.u32.totalorder %s1026_s0, %s1463_s4 }
  0x13   :  { %p1032_p7 = pnand %p1030_p6, %p1027_p5 }
  0x15   :  { %1035 = shalt.err (!%p1032_p7)
}
  0x16   :  { %s1036_s14 = scalar_lea.vmem %s31_s30, 32768  ;;  %p1041_p9 = scmp.lt.s32.totalorder %s31_s30, %s31_s30 }
  0x17   :  { %p1037_p8 = scmp.ne.s32.totalorder %s31_s30, %s1036_s14  ;;  %p1042_p10 = scmp.lt.s32.totalorder %s1036_s14, %s1036_s14 }
  0x19   :  { %p1043_p11 = por %p1042_p10, %p1041_p9 }
  0x1b   :  { %p1044_p12 = pnand %p1043_p11, %p1037_p8 }
  0x1d   :  { %1047 = shalt.err (!%p1044_p12)
}
  0x1e   :  { %s1062_s15 = smov 128   ;;  %s1063_s16 = smov 8  }
  0x1f   :  { %36 = dma.hbm_to_vmem [thread:$0]  %s1463_s4, 32768, %s31_s30, [#allocation7], %s1062_s15, %s1062_s15, %s1063_s16  }
  0x20   :  { %1054 = dma.done.wait [#allocation7], 32768  }
  0x21   :  { %1055 = vsyncadd [#allocation7], 4294934528  ;;  %v1064_v0 = vmov 0.0   ;;  %v215_v1 = vld [vmem:[%s1464_s5] sm:$0xff]  ;;  %v216_v2 = vld [vmem:[%s1464_s5 + $0x8] sm:$0xff]  ;;  %vm53_vm0 = vcmask 130048   ;;  %v223_v18 = vlaneseq }
  0x22   :  { %121 = vmatprep.mubr.f32.mxu0 %v1064_v0  ;;  %192 = vmatprep.mubr.f32.mxu1 %v1064_v0  ;;  %v217_v3 = vld [vmem:[%s1464_s5 + $0x10] sm:$0xff]  ;;  %v218_v4 = vld [vmem:[%s1464_s5 + $0x18] sm:$0xff]  ;;  %219 = vst [vmem:[#allocation3] sm:$0xff] %v215_v1  ;;  %220 = vst [vmem:[#allocation3 + $0x8] sm:$0xff] %v216_v2  ;;  %s1174_s25 = smov 0  }
  0x23   :  { %221 = vst [vmem:[#allocation3 + $0x10] sm:$0xff] %v217_v3  ;;  %v46_v5 = vld [vmem:[%s1461_s2 + $0x8] sm:$0xff]  ;;  %222 = vst [vmem:[#allocation3 + $0x18] sm:$0xff] %v218_v4  ;;  %v48_v8 = vld [vmem:[%s1461_s2 + $0x18] sm:$0xff]  ;;  %v1160_v19 = vand.u32 127, %v223_v18 }
  0x24   :  { %v50_v6 = vld [vmem:[%s1461_s2 + $0x28] sm:$0xff]  ;;  %v52_v9 = vld [vmem:[%s1461_s2 + $0x38] sm:$0xff]  ;;  %v45_v10 = vld [vmem:[%s1461_s2] sm:$0xff] }
  0x25   :  { %v862_v7 = vpack.c.bf16 %v50_v6, %v46_v5  ;;  %v866_v11 = vpack.c.bf16 %v52_v9, %v48_v8  ;;  %v49_v12 = vld [vmem:[%s1461_s2 + $0x20] sm:$0xff]  ;;  %v47_v13 = vld [vmem:[%s1461_s2 + $0x10] sm:$0xff]  ;;  %v204_v27 = vld [vmem:[%s1462_s3 + $0x8] sm:$0xff] }
  0x26   :  { %v51_v14 = vld [vmem:[%s1461_s2 + $0x30] sm:$0xff]  ;;  %v864_v15 = vpack.c.bf16 %v49_v12, %v45_v10  ;;  %v44_v17 = vld [vmem:[%s1460_s1] sm:$0xff]  ;;  %v206_v29 = vld [vmem:[%s1462_s3 + $0x18] sm:$0xff] }
  0x27   :  { %863 = vmatprep.subr.bf16.mxu0 %v862_v7  ;;  %v868_v16 = vpack.c.bf16 %v51_v14, %v47_v13  ;;  %867 = vmatprep.subr.bf16.mxu1 %v866_v11  ;;  %v203_v21 = vld [vmem:[%s1462_s3] sm:$0xff]  ;;  %v205_v23 = vld [vmem:[%s1462_s3 + $0x10] sm:$0xff] }
  0x28   :  { %865 = vmatpush1.bf16.msra.mxu0 %v864_v15 }
  0x29   :  { %869 = vmatpush1.bf16.msra.mxu1 %v868_v16 }
  0x2b   :  { %712 = vmatmul.mubr.msk.f32.vlgmr.msra.gmra.mrb[0].mxu0 %vm53_vm0, %v44_v17 }
  0x2c   :  { %713 = vmatmul.mubr.msk.f32.vlgmr.msra.gmra.mrb[0].mxu1 %vm53_vm0, %v44_v17 }
  0xfe   :  { %v123_v20 = vpop.f32.mrb[0].mxu0 }
  0xff   :  { %v194_v22 = vpop.f32.mrb[0].mxu1  ;;  %v199_v24 = vmul.f32 -2.0, %v123_v20  ;;  %v125_v26 = vpop.f32.mrb[1].mxu0 }
 0x100   :  { %v201_v25 = vmul.f32 -2.0, %v194_v22  ;;  %v196_v28 = vpop.f32.mrb[1].mxu1  ;;  %v200_v30 = vmul.f32 -2.0, %v125_v26 }
 0x101   :  { %v202_v31 = vmul.f32 -2.0, %v196_v28  ;;  %v207_v32 = vadd.f32 %v203_v21, %v199_v24 }
 0x102   :  { %v209_v33 = vadd.f32 %v205_v23, %v201_v25  ;;  %v208_v34 = vadd.f32 %v204_v27, %v200_v30 }
 0x103   :  { %v210_v35 = vadd.f32 %v206_v29, %v202_v31  ;;  %211 = vst [vmem:[#allocation2] sm:$0xff] %v207_v32 }
 0x104   :  { %213 = vst [vmem:[#allocation2 + $0x10] sm:$0xff] %v209_v33  ;;  %212 = vst [vmem:[#allocation2 + $0x8] sm:$0xff] %v208_v34 }
 0x105   :  { %214 = vst [vmem:[#allocation2 + $0x18] sm:$0xff] %v210_v35 }
 0x106 LB: > { %v312_v36 = vld [vmem:[#allocation3 + $0x8] sm:$0xff]  ;;  %v314_v37 = vld [vmem:[#allocation3 + $0x18] sm:$0xff]  ;;  %p231_p13 = scmp.lt.s32.totalorder %s1058_s25, 0  ;;  %s232_s3 = ssub.s32 0, %s1058_s25  ;;  %s1058_s25 = sphi %s1174_s25, %s230_s25  }
 0x107   : > { %379 = vmatprep.mubr.f32.mxu0 %v312_v36  ;;  %449 = vmatprep.mubr.f32.mxu1 %v314_v37  ;;  %s714_s26 = smin.u32 %s1058_s25, %s232_s3  ;;  %s230_s25 = sadd.s32 1, %s1058_s25  }
 0x108   : > { %s234_s4 = sand.u32 3, %s714_s26   ;;  %p227_p1 = scmp.ge.s32.totalorder %s230_s25, 8  }
 0x109   : > { %s235_s27 = ssub.s32 0, %s234_s4  ;;  %vm694_vm4 = vcmask (%p227_p1), 31744  }
 0x10a   : > { %s1468_s27 = smov (!%p231_p13, %s235_s27), %s234_s4 }
 0x10b   : > { %p716_p0 = scmp.lt.s32.totalorder %s1468_s27, 0  ;;  %s241_s28 = sadd.s32 4, %s1468_s27 }
 0x10d   : > { %s1470_s28 = smov (!%p716_p0, %s241_s28), %s1468_s27 }
 0x10e   : > { %s1182_s29 = sld [smem:[#allocation5 + %s1470_s28]] }
 0x114   : > { %s718_s30 = sshll.u32 %s1182_s29, 9  ;;  %s717_s9 = sshll.u32 %s1182_s29, 7 }
 0x115   : > { %s1185_s8 = scalar_lea.vmem [#allocation6], %s718_s30  ;;  %s1252_s0 = sshra.s32 %s717_s9, 7 }
 0x116   : > { %v263_v38 = vld [vmem:[%s1185_s8 + $0x80] sm:$0xff]  ;;  %v264_v39 = vld [vmem:[%s1185_s8 + $0x88] sm:$0xff]  ;;  %v265_v49 = vld [vmem:[%s1185_s8 + $0x90] sm:$0xff]  ;;  %s719_s5 = sshll.u32 %s1252_s0, 3 }
 0x117   : > { %v295_v40 = vld [vmem:[%s1185_s8 + $0x180] sm:$0xff]  ;;  %v870_v41 = vpack.c.bf16 %v264_v39, %v263_v38  ;;  %v296_v42 = vld [vmem:[%s1185_s8 + $0x188] sm:$0xff]  ;;  %v266_v51 = vld [vmem:[%s1185_s8 + $0x98] sm:$0xff]  ;;  %s458_s10 = scalar_lea.vmem [#allocation2], %s719_s5  ;;  %s483_s11 = scalar_lea.vmem [#allocation3], %s719_s5 }
 0x118   : > { %v247_v43 = vld [vmem:[%s1185_s8] sm:$0xff]  ;;  %v248_v44 = vld [vmem:[%s1185_s8 + $0x8] sm:$0xff]  ;;  %v902_v45 = vpack.c.bf16 %v296_v42, %v295_v40  ;;  %v297_v52 = vld [vmem:[%s1185_s8 + $0x190] sm:$0xff]  ;;  %v874_v54 = vpack.c.bf16 %v266_v51, %v265_v49 }
 0x119   : > { %v872_v46 = vpack.c.bf16 %v248_v44, %v247_v43  ;;  %v279_v47 = vld [vmem:[%s1185_s8 + $0x100] sm:$0xff]  ;;  %v280_v48 = vld [vmem:[%s1185_s8 + $0x108] sm:$0xff]  ;;  %871 = vmatprep.subr.bf16.mxu0 %v870_v41  ;;  %v298_v53 = vld [vmem:[%s1185_s8 + $0x198] sm:$0xff] }
 0x11a   : > { %v904_v50 = vpack.c.bf16 %v280_v48, %v279_v47  ;;  %903 = vmatprep.subr.bf16.mxu1 %v902_v45  ;;  %v906_v55 = vpack.c.bf16 %v298_v53, %v297_v52  ;;  %v249_v56 = vld [vmem:[%s1185_s8 + $0x10] sm:$0xff]  ;;  %v250_v57 = vld [vmem:[%s1185_s8 + $0x18] sm:$0xff]  ;;  %v267_v61 = vld [vmem:[%s1185_s8 + $0xa0] sm:$0xff] }
 0x11b   : > { %873 = vmatpush3.bf16.msra.mxu0 %v872_v46  ;;  %v281_v58 = vld [vmem:[%s1185_s8 + $0x110] sm:$0xff]  ;;  %v876_v59 = vpack.c.bf16 %v250_v57, %v249_v56  ;;  %v282_v60 = vld [vmem:[%s1185_s8 + $0x118] sm:$0xff]  ;;  %v268_v62 = vld [vmem:[%s1185_s8 + $0xa8] sm:$0xff] }
 0x11c   : > { %905 = vmatpush3.bf16.msra.mxu1 %v904_v50  ;;  %875 = vmatprep.subr.bf16.mxu0 %v874_v54  ;;  %v908_v63 = vpack.c.bf16 %v282_v60, %v281_v58  ;;  %v878_v0 = vpack.c.bf16 %v268_v62, %v267_v61  ;;  %v299_v1 = vld [vmem:[%s1185_s8 + $0x1a0] sm:$0xff]  ;;  %v300_v2 = vld [vmem:[%s1185_s8 + $0x1a8] sm:$0xff]  ;;  %v269_v9 = vld [vmem:[%s1185_s8 + $0xb0] sm:$0xff] }
 0x11d   : > { %907 = vmatprep.subr.bf16.mxu1 %v906_v55  ;;  %v251_v3 = vld [vmem:[%s1185_s8 + $0x20] sm:$0xff]  ;;  %v910_v4 = vpack.c.bf16 %v300_v2, %v299_v1  ;;  %v252_v5 = vld [vmem:[%s1185_s8 + $0x28] sm:$0xff]  ;;  %v270_v10 = vld [vmem:[%s1185_s8 + $0xb8] sm:$0xff] }
 0x11e   : > { %v283_v6 = vld [vmem:[%s1185_s8 + $0x120] sm:$0xff]  ;;  %v284_v7 = vld [vmem:[%s1185_s8 + $0x128] sm:$0xff]  ;;  %v880_v8 = vpack.c.bf16 %v252_v5, %v251_v3  ;;  %v301_v11 = vld [vmem:[%s1185_s8 + $0x1b0] sm:$0xff]  ;;  %v882_v13 = vpack.c.bf16 %v270_v10, %v269_v9 }
 0x11f   : > { %877 = vmatpush3.bf16.msra.mxu0 %v876_v59  ;;  %v912_v12 = vpack.c.bf16 %v284_v7, %v283_v6  ;;  %v302_v14 = vld [vmem:[%s1185_s8 + $0x1b8] sm:$0xff]  ;;  %v253_v15 = vld [vmem:[%s1185_s8 + $0x30] sm:$0xff]  ;;  %v271_v21 = vld [vmem:[%s1185_s8 + $0xc0] sm:$0xff] }
 0x120   : > { %909 = vmatpush3.bf16.msra.mxu1 %v908_v63  ;;  %879 = vmatprep.subr.bf16.mxu0 %v878_v0  ;;  %v254_v16 = vld [vmem:[%s1185_s8 + $0x38] sm:$0xff]  ;;  %v914_v17 = vpack.c.bf16 %v302_v14, %v301_v11  ;;  %v285_v18 = vld [vmem:[%s1185_s8 + $0x130] sm:$0xff]  ;;  %v272_v22 = vld [vmem:[%s1185_s8 + $0xc8] sm:$0xff] }
 0x121   : > { %911 = vmatprep.subr.bf16.mxu1 %v910_v4  ;;  %v286_v20 = vld [vmem:[%s1185_s8 + $0x138] sm:$0xff]  ;;  %v303_v23 = vld [vmem:[%s1185_s8 + $0x1c0] sm:$0xff]  ;;  %v304_v24 = vld [vmem:[%s1185_s8 + $0x1c8] sm:$0xff]  ;;  %v884_v25 = vpack.c.bf16 %v254_v16, %v253_v15  ;;  %v886_v27 = vpack.c.bf16 %v272_v22, %v271_v21 }
 0x122   : > { %v916_v26 = vpack.c.bf16 %v286_v20, %v285_v18  ;;  %v255_v28 = vld [vmem:[%s1185_s8 + $0x40] sm:$0xff]  ;;  %v256_v29 = vld [vmem:[%s1185_s8 + $0x48] sm:$0xff]  ;;  %v918_v31 = vpack.c.bf16 %v304_v24, %v303_v23  ;;  %v273_v33 = vld [vmem:[%s1185_s8 + $0xd0] sm:$0xff] }
 0x123   : > { %881 = vmatpush3.bf16.msra.mxu0 %v880_v8  ;;  %v287_v30 = vld [vmem:[%s1185_s8 + $0x140] sm:$0xff]  ;;  %v288_v32 = vld [vmem:[%s1185_s8 + $0x148] sm:$0xff]  ;;  %v274_v34 = vld [vmem:[%s1185_s8 + $0xd8] sm:$0xff]  ;;  %v888_v37 = vpack.c.bf16 %v256_v29, %v255_v28 }
 0x124   : > { %913 = vmatpush3.bf16.msra.mxu1 %v912_v12  ;;  %883 = vmatprep.subr.bf16.mxu0 %v882_v13  ;;  %v305_v35 = vld [vmem:[%s1185_s8 + $0x1d0] sm:$0xff]  ;;  %v306_v36 = vld [vmem:[%s1185_s8 + $0x1d8] sm:$0xff]  ;;  %v920_v38 = vpack.c.bf16 %v288_v32, %v287_v30  ;;  %v890_v39 = vpack.c.bf16 %v274_v34, %v273_v33  ;;  %v275_v45 = vld [vmem:[%s1185_s8 + $0xe0] sm:$0xff]  ;;  %v1065_v32 = vmov 0.0  }
 0x125   : > { %915 = vmatprep.subr.bf16.mxu1 %v914_v17  ;;  %v257_v40 = vld [vmem:[%s1185_s8 + $0x50] sm:$0xff]  ;;  %v258_v41 = vld [vmem:[%s1185_s8 + $0x58] sm:$0xff]  ;;  %v922_v43 = vpack.c.bf16 %v306_v36, %v305_v35  ;;  %v276_v46 = vld [vmem:[%s1185_s8 + $0xe8] sm:$0xff] }
 0x126   : > { %v289_v42 = vld [vmem:[%s1185_s8 + $0x150] sm:$0xff]  ;;  %v290_v44 = vld [vmem:[%s1185_s8 + $0x158] sm:$0xff]  ;;  %v307_v47 = vld [vmem:[%s1185_s8 + $0x1e0] sm:$0xff]  ;;  %v892_v49 = vpack.c.bf16 %v258_v41, %v257_v40  ;;  %v894_v51 = vpack.c.bf16 %v276_v46, %v275_v45 }
 0x127   : > { %885 = vmatpush3.bf16.msra.mxu0 %v884_v25  ;;  %v308_v48 = vld [vmem:[%s1185_s8 + $0x1e8] sm:$0xff]  ;;  %v924_v50 = vpack.c.bf16 %v290_v44, %v289_v42  ;;  %v259_v52 = vld [vmem:[%s1185_s8 + $0x60] sm:$0xff]  ;;  %v277_v57 = vld [vmem:[%s1185_s8 + $0xf0] sm:$0xff] }
 0x128   : > { %917 = vmatpush3.bf16.msra.mxu1 %v916_v26  ;;  %887 = vmatprep.subr.bf16.mxu0 %v886_v27  ;;  %v260_v53 = vld [vmem:[%s1185_s8 + $0x68] sm:$0xff]  ;;  %v291_v54 = vld [vmem:[%s1185_s8 + $0x160] sm:$0xff]  ;;  %v926_v55 = vpack.c.bf16 %v308_v48, %v307_v47  ;;  %v278_v58 = vld [vmem:[%s1185_s8 + $0xf8] sm:$0xff] }
 0x129   : > { %919 = vmatprep.subr.bf16.mxu1 %v918_v31  ;;  %v292_v56 = vld [vmem:[%s1185_s8 + $0x168] sm:$0xff]  ;;  %v309_v59 = vld [vmem:[%s1185_s8 + $0x1f0] sm:$0xff]  ;;  %v310_v60 = vld [vmem:[%s1185_s8 + $0x1f8] sm:$0xff]  ;;  %v896_v61 = vpack.c.bf16 %v260_v53, %v259_v52  ;;  %v898_v63 = vpack.c.bf16 %v278_v58, %v277_v57 }
 0x12a   : > { %v928_v62 = vpack.c.bf16 %v292_v56, %v291_v54  ;;  %v261_v0 = vld [vmem:[%s1185_s8 + $0x70] sm:$0xff]  ;;  %v262_v1 = vld [vmem:[%s1185_s8 + $0x78] sm:$0xff]  ;;  %v930_v2 = vpack.c.bf16 %v310_v60, %v309_v59  ;;  %v311_v7 = vld [vmem:[#allocation3] sm:$0xff] }
 0x12b   : > { %889 = vmatpush3.bf16.msra.mxu0 %v888_v37  ;;  %v293_v3 = vld [vmem:[%s1185_s8 + $0x170] sm:$0xff]  ;;  %v294_v4 = vld [vmem:[%s1185_s8 + $0x178] sm:$0xff]  ;;  %v900_v5 = vpack.c.bf16 %v262_v1, %v261_v0  ;;  %v459_v15 = vld [vmem:[%s458_s10] sm:$0xff] }
 0x12c   : > { %921 = vmatpush3.bf16.msra.mxu1 %v920_v38  ;;  %891 = vmatprep.subr.bf16.mxu0 %v890_v39  ;;  %v932_v6 = vpack.c.bf16 %v294_v4, %v293_v3  ;;  %v313_v8 = vld [vmem:[#allocation3 + $0x10] sm:$0xff]  ;;  %v505_v34 = vld [vmem:[%s1465_s6 + $0x80] sm:$0xff] (%p227_p1)  ;;  %v506_v35 = vld [vmem:[%s1465_s6 + $0x88] sm:$0xff] (%p227_p1) }
 0x12d   : > { %923 = vmatprep.subr.bf16.mxu1 %v922_v43  ;;  %v489_v36 = vld [vmem:[%s1465_s6] sm:$0xff] (%p227_p1)  ;;  %v934_v37 = vpack.c.bf16 (%p227_p1), %v506_v35, %v505_v34  ;;  %v490_v38 = vld [vmem:[%s1465_s6 + $0x8] sm:$0xff] (%p227_p1)  ;;  %v507_v44 = vld [vmem:[%s1465_s6 + $0x90] sm:$0xff] (%p227_p1) }
 0x12e   :  { %v538_v39 = vld [vmem:[%s1465_s6 + $0x188] sm:$0xff] (%p227_p1)  ;;  %v936_v40 = vpack.c.bf16 (%p227_p1), %v490_v38, %v489_v36  ;;  %v521_v42 = vld [vmem:[%s1465_s6 + $0x100] sm:$0xff] (%p227_p1)  ;;  %v508_v46 = vld [vmem:[%s1465_s6 + $0x98] sm:$0xff] (%p227_p1) }
 0x12f   : > { %893 = vmatpush3.bf16.msra.mxu0 %v892_v49  ;;  %v522_v43 = vld [vmem:[%s1465_s6 + $0x108] sm:$0xff] (%p227_p1)  ;;  %v491_v47 = vld [vmem:[%s1465_s6 + $0x10] sm:$0xff] (%p227_p1)  ;;  %v492_v48 = vld [vmem:[%s1465_s6 + $0x18] sm:$0xff] (%p227_p1)  ;;  %v938_v49 = vpack.c.bf16 (%p227_p1), %v508_v46, %v507_v44 }
 0x130   : > { %925 = vmatpush3.bf16.msra.mxu1 %v924_v50  ;;  %895 = vmatprep.subr.bf16.mxu0 %v894_v51  ;;  %v968_v45 = vpack.c.bf16 (%p227_p1), %v522_v43, %v521_v42  ;;  %v940_v50 = vpack.c.bf16 (%p227_p1), %v492_v48, %v491_v47  ;;  %v539_v51 = vld [vmem:[%s1465_s6 + $0x190] sm:$0xff] (%p227_p1)  ;;  %v540_v52 = vld [vmem:[%s1465_s6 + $0x198] sm:$0xff] (%p227_p1)  ;;  %v509_v56 = vld [vmem:[%s1465_s6 + $0xa0] sm:$0xff] (%p227_p1) }
 0x131   : > { %927 = vmatprep.subr.bf16.mxu1 %v926_v55  ;;  %v523_v53 = vld [vmem:[%s1465_s6 + $0x110] sm:$0xff] (%p227_p1)  ;;  %v970_v54 = vpack.c.bf16 (%p227_p1), %v540_v52, %v539_v51  ;;  %v524_v55 = vld [vmem:[%s1465_s6 + $0x118] sm:$0xff] (%p227_p1)  ;;  %v510_v57 = vld [vmem:[%s1465_s6 + $0xa8] sm:$0xff] (%p227_p1) }
 0x132   :  { %v972_v58 = vpack.c.bf16 (%p227_p1), %v524_v55, %v523_v53  ;;  %v942_v59 = vpack.c.bf16 (%p227_p1), %v510_v57, %v509_v56  ;;  %v493_v60 = vld [vmem:[%s1465_s6 + $0x20] sm:$0xff] (%p227_p1)  ;;  %v526_v1 = vld [vmem:[%s1465_s6 + $0x128] sm:$0xff] (%p227_p1)  ;;  %v511_v4 = vld [vmem:[%s1465_s6 + $0xb0] sm:$0xff] (%p227_p1) }
 0x133   : > { %897 = vmatpush3.bf16.msra.mxu0 %v896_v61  ;;  %v494_v61 = vld [vmem:[%s1465_s6 + $0x28] sm:$0xff] (%p227_p1)  ;;  %v525_v0 = vld [vmem:[%s1465_s6 + $0x120] sm:$0xff] (%p227_p1)  ;;  %v499_v35 = vld [vmem:[%s1465_s6 + $0x50] sm:$0xff] (%p227_p1) }
 0x134   : > { %929 = vmatpush3.bf16.msra.mxu1 %v928_v62  ;;  %899 = vmatprep.subr.bf16.mxu0 %v898_v63  ;;  %v541_v62 = vld [vmem:[%s1465_s6 + $0x1a0] sm:$0xff] (%p227_p1)  ;;  %v542_v63 = vld [vmem:[%s1465_s6 + $0x1a8] sm:$0xff] (%p227_p1)  ;;  %v500_v36 = vld [vmem:[%s1465_s6 + $0x58] sm:$0xff] (%p227_p1) }
 0x135   : > { %931 = vmatprep.subr.bf16.mxu1 %v930_v2  ;;  %v944_v2 = vpack.c.bf16 (%p227_p1), %v494_v61, %v493_v60  ;;  %v974_v3 = vpack.c.bf16 (%p227_p1), %v542_v63, %v541_v62  ;;  %v550_v42 = vld [vmem:[%s1465_s6 + $0x1e8] sm:$0xff] (%p227_p1)  ;;  %v956_v43 = vpack.c.bf16 (%p227_p1), %v500_v36, %v499_v35  ;;  %v501_v44 = vld [vmem:[%s1465_s6 + $0x60] sm:$0xff] (%p227_p1)  ;;  %v519_v52 = vld [vmem:[%s1465_s6 + $0xf0] sm:$0xff] (%p227_p1) }
 0x136   :  { %v533_v48 = vld [vmem:[%s1465_s6 + $0x160] sm:$0xff] (%p227_p1)  ;;  %v520_v53 = vld [vmem:[%s1465_s6 + $0xf8] sm:$0xff] (%p227_p1)  ;;  %v551_v55 = vld [vmem:[%s1465_s6 + $0x1f0] sm:$0xff] (%p227_p1) }
 0x137   : > { %901 = vmatpush3.bf16.msra.mxu0 %v900_v5  ;;  %v512_v5 = vld [vmem:[%s1465_s6 + $0xb8] sm:$0xff] (%p227_p1)  ;;  %v503_v60 = vld [vmem:[%s1465_s6 + $0x70] sm:$0xff] (%p227_p1) }
 0x138   : > { %933 = vmatpush3.bf16.msra.mxu1 %v932_v6  ;;  %935 = vmatprep.subr.bf16.mxu0 (%p227_p1), %v934_v37  ;;  %v495_v6 = vld [vmem:[%s1465_s6 + $0x30] sm:$0xff] (%p227_p1)  ;;  %v552_v56 = vld [vmem:[%s1465_s6 + $0x1f8] sm:$0xff] (%p227_p1) }
 0x139   :  { %v531_v37 = vld [vmem:[%s1465_s6 + $0x150] sm:$0xff] (%p227_p1)  ;;  %v504_v61 = vld [vmem:[%s1465_s6 + $0x78] sm:$0xff] (%p227_p1)  ;;  %v994_v62 = vpack.c.bf16 (%p227_p1), %v552_v56, %v551_v55 }
 0x13a   : > { %380 = vmatmul.mubr.f32.vlgmr.msra.gmra.mrb[0].mxu0 %v311_v7  ;;  %v976_v7 = vpack.c.bf16 (%p227_p1), %v526_v1, %v525_v0  ;;  %v535_v63 = vld [vmem:[%s1465_s6 + $0x170] sm:$0xff] (%p227_p1)  ;;  %v536_v0 = vld [vmem:[%s1465_s6 + $0x178] sm:$0xff] (%p227_p1)  ;;  %v964_v1 = vpack.c.bf16 (%p227_p1), %v504_v61, %v503_v60 }
 0x13b   : > { %450 = vmatmul.mubr.f32.vlgmr.msra.gmra.mrb[0].mxu1 %v313_v8  ;;  %937 = vmatpush3.bf16.msra.mxu0 (%p227_p1), %v936_v40  ;;  %v946_v8 = vpack.c.bf16 (%p227_p1), %v512_v5, %v511_v4  ;;  %v518_v40 = vld [vmem:[%s1465_s6 + $0xe8] sm:$0xff] (%p227_p1) }
 0x13c   :  { %939 = vmatprep.subr.bf16.mxu0 (%p227_p1), %v938_v49  ;;  %v534_v49 = vld [vmem:[%s1465_s6 + $0x168] sm:$0xff] (%p227_p1) }
 0x13f   :  { %941 = vmatpush3.bf16.msra.mxu0 (%p227_p1), %v940_v50 }
 0x140   :  { %943 = vmatprep.subr.bf16.mxu0 (%p227_p1), %v942_v59  ;;  %v962_v59 = vpack.c.bf16 (%p227_p1), %v520_v53, %v519_v52 }
 0x143   :  { %945 = vmatpush3.bf16.msra.mxu0 (%p227_p1), %v944_v2  ;;  %v996_v2 = vpack.c.bf16 (%p227_p1), %v536_v0, %v535_v63 }
 0x144   :  { %947 = vmatprep.subr.bf16.mxu0 (%p227_p1), %v946_v8 }
 0x20d   : > { %v754_v9 = vpop.f32.mrb[0].mxu0 }
 0x20e   : > { %v789_v10 = vpop.f32.mrb[0].mxu1  ;;  %v755_v11 = vpop.f32.mrb[1].mxu0 }
 0x20f   : > { %v756_v12 = vadd.f32 %v755_v11, %v754_v9  ;;  %v790_v13 = vpop.f32.mrb[1].mxu1  ;;  %v496_v9 = vld [vmem:[%s1465_s6 + $0x38] sm:$0xff] (%p227_p1) }
 0x210   : > { %v791_v14 = vadd.f32 %v790_v13, %v789_v10  ;;  %v543_v10 = vld [vmem:[%s1465_s6 + $0x1b0] sm:$0xff] (%p227_p1)  ;;  %v544_v11 = vld [vmem:[%s1465_s6 + $0x1b8] sm:$0xff] (%p227_p1) }
 0x211   :  { %v527_v13 = vld [vmem:[%s1465_s6 + $0x130] sm:$0xff] (%p227_p1) }
 0x212   : > { %v452_v16 = vadd.f32 %v791_v14, %v756_v12  ;;  %v978_v12 = vpack.c.bf16 (%p227_p1), %v544_v11, %v543_v10  ;;  %v528_v14 = vld [vmem:[%s1465_s6 + $0x138] sm:$0xff] (%p227_p1) }
 0x214   : > { %v460_v17 = vadd.f32 %v459_v15, %v452_v16  ;;  %v513_v15 = vld [vmem:[%s1465_s6 + $0xc0] sm:$0xff] (%p227_p1)  ;;  %v514_v16 = vld [vmem:[%s1465_s6 + $0xc8] sm:$0xff] (%p227_p1) }
 0x216   : > { %461 = vmin.xlane.f32.xlu0 %v460_v17 }
 0x2a3   : > { %v462_v18 = vpop.xlane.xlu0 %461 }
 0x2a4   : > { %vm463_vm1 = vcmp.eq.f32.partialorder %v460_v17, %v462_v18  ;;  %v948_v17 = vpack.c.bf16 (%p227_p1), %v496_v9, %v495_v6  ;;  %v545_v18 = vld [vmem:[%s1465_s6 + $0x1c0] sm:$0xff] (%p227_p1) }
 0x2a5   : > { %v464_v20 = vsel %vm463_vm1, %v1160_v19, 128 }
 0x2a6   : > { %v466_v21 = vshra.s32 %v464_v20, 16  ;;  %v465_v23 = vand.u32 65535, %v464_v20  ;;  %v546_v20 = vld [vmem:[%s1465_s6 + $0x1c8] sm:$0xff] (%p227_p1)  ;;  %949 = vmatpush3.bf16.msra.mxu0 (%p227_p1), %v948_v17 }
 0x2a8   : > { %v468_v22 = vcvt.s32.f32 %v466_v21  ;;  %v467_v25 = vcvt.s32.f32 %v465_v23  ;;  %v980_v21 = vpack.c.bf16 (%p227_p1), %v528_v14, %v527_v13  ;;  %v497_v23 = vld [vmem:[%s1465_s6 + $0x40] sm:$0xff] (%p227_p1) }
 0x2aa   : > { %469 = vmin.xlane.f32.xlu0 %v468_v22 }
 0x337   : > { %v470_v24 = vpop.xlane.xlu0 %469 }
 0x338   : > { %vm471_vm2 = vcmp.eq.f32.partialorder %v468_v22, %v470_v24  ;;  %v476_v27 = vcvt.f32.s32 %v470_v24  ;;  %v950_v22 = vpack.c.bf16 (%p227_p1), %v514_v16, %v513_v15  ;;  %v498_v24 = vld [vmem:[%s1465_s6 + $0x48] sm:$0xff] (%p227_p1) }
 0x339   : > { %v472_v26 = vsel %vm471_vm2, %v467_v25, inf  ;;  %v529_v25 = vld [vmem:[%s1465_s6 + $0x140] sm:$0xff] (%p227_p1) }
 0x33a   : > { %473 = vmin.xlane.f32.xlu1 %v472_v26  ;;  %v477_v29 = vshll.u32 %v476_v27, 16  ;;  %v982_v26 = vpack.c.bf16 (%p227_p1), %v546_v20, %v545_v18  ;;  %v530_v27 = vld [vmem:[%s1465_s6 + $0x148] sm:$0xff] (%p227_p1)  ;;  %951 = vmatprep.subr.bf16.mxu0 (%p227_p1), %v950_v22 }
 0x3c7   : > { %v474_v28 = vpop.xlane.xlu1 %473 }
 0x3c8   : > { %v475_v30 = vcvt.f32.s32 %v474_v28  ;;  %229 = sbr.rel (!%p227_p1) target bundleno = 262 (0x106), region = 58  ;;  %v515_v28 = vld [vmem:[%s1465_s6 + $0xd0] sm:$0xff] (%p227_p1) }
 0x3ca   : > { %v478_v31 = vadd.s32 %v477_v29, %v475_v30  ;;  %v516_v29 = vld [vmem:[%s1465_s6 + $0xd8] sm:$0xff] (%p227_p1)  ;;  %v547_v30 = vld [vmem:[%s1465_s6 + $0x1d0] sm:$0xff] (%p227_p1) }
 0x3cb   :  { %v954_v34 = vpack.c.bf16 (%p227_p1), %v516_v29, %v515_v28 }
 0x3cc   : > { %vm479_vm3 = vcmp.eq.s32.totalorder %v1160_v19, %v478_v31  ;;  %v537_v19 = vld [vmem:[%s1465_s6 + $0x180] sm:$0xff] (%p227_p1)  ;;  %v548_v31 = vld [vmem:[%s1465_s6 + $0x1d8] sm:$0xff] (%p227_p1) }
 0x3cd   : > { %v720_v33 = vsel %vm479_vm3, 1.0, %v1065_v32  ;;  %v966_v41 = vpack.c.bf16 (%p227_p1), %v538_v39, %v537_v19  ;;  %v952_v32 = vpack.c.bf16 (%p227_p1), %v498_v24, %v497_v23  ;;  %v986_v38 = vpack.c.bf16 (%p227_p1), %v548_v31, %v547_v30  ;;  %v532_v19 = vld [vmem:[%s1465_s6 + $0x158] sm:$0xff] (%p227_p1)  ;;  %v517_v39 = vld [vmem:[%s1465_s6 + $0xe0] sm:$0xff] (%p227_p1) }
 0x3ce   : > { %484 = vst [vmem:[%s483_s11] sm:$0xff] %v720_v33  ;;  %v984_v33 = vpack.c.bf16 (%p227_p1), %v530_v27, %v529_v25  ;;  %v988_v46 = vpack.c.bf16 (%p227_p1), %v532_v19, %v531_v37  ;;  %v958_v47 = vpack.c.bf16 (%p227_p1), %v518_v40, %v517_v39 }
 0x3cf   :  { %967 = vmatprep.subr.bf16.mxu1 %v966_v41  ;;  %v549_v41 = vld [vmem:[%s1465_s6 + $0x1e0] sm:$0xff]  ;;  %953 = vmatpush3.bf16.msra.mxu0 %v952_v32 }
 0x3d0   :  { %969 = vmatpush3.bf16.msra.mxu1 %v968_v45  ;;  %v502_v45 = vld [vmem:[%s1465_s6 + $0x68] sm:$0xff]  ;;  %955 = vmatprep.subr.bf16.mxu0 %v954_v34  ;;  %v990_v51 = vpack.c.bf16 %v550_v42, %v549_v41 }
 0x3d1   :  { %971 = vmatprep.subr.bf16.mxu1 %v970_v54  ;;  %v960_v57 = vpack.c.bf16 %v502_v45, %v501_v44 }
 0x3d3   :  { %957 = vmatpush3.bf16.msra.mxu0 %v956_v43 }
 0x3d4   :  { %973 = vmatpush3.bf16.msra.mxu1 %v972_v58  ;;  %959 = vmatprep.subr.bf16.mxu0 %v958_v47  ;;  %v992_v58 = vpack.c.bf16 %v534_v49, %v533_v48 }
 0x3d5   :  { %975 = vmatprep.subr.bf16.mxu1 %v974_v3  ;;  %v486_v50 = vld [vmem:[#allocation3 + $0x8] sm:$0xff]  ;;  %v488_v54 = vld [vmem:[#allocation3 + $0x18] sm:$0xff]  ;;  %v485_v3 = vld [vmem:[#allocation3] sm:$0xff] }
 0x3d6   :  { %617 = vmatprep.mubr.f32.mxu0 %v486_v50  ;;  %687 = vmatprep.mubr.f32.mxu1 %v488_v54  ;;  %v487_v4 = vld [vmem:[#allocation3 + $0x10] sm:$0xff] }
 0x3d7   :  { %961 = vmatpush3.bf16.msra.mxu0 %v960_v57 }
 0x3d8   :  { %977 = vmatpush3.bf16.msra.mxu1 %v976_v7  ;;  %963 = vmatprep.subr.bf16.mxu0 %v962_v59 }
 0x3d9   :  { %979 = vmatprep.subr.bf16.mxu1 %v978_v12 }
 0x3db   :  { %965 = vmatpush3.bf16.msra.mxu0 %v964_v1 }
 0x3dc   :  { %981 = vmatpush3.bf16.msra.mxu1 %v980_v21 }
 0x3dd   :  { %983 = vmatprep.subr.bf16.mxu1 %v982_v26 }
 0x3de   :  { %618 = vmatmul.mubr.f32.vlgmr.msra.gmra.mrb[0].mxu0 %v485_v3 }
 0x3e0   :  { %985 = vmatpush3.bf16.msra.mxu1 %v984_v33 }
 0x3e1   :  { %987 = vmatprep.subr.bf16.mxu1 %v986_v38 }
 0x3e4   :  { %989 = vmatpush3.bf16.msra.mxu1 %v988_v46 }
 0x3e5   :  { %991 = vmatprep.subr.bf16.mxu1 %v990_v51 }
 0x3e8   :  { %993 = vmatpush3.bf16.msra.mxu1 %v992_v58 }
 0x3e9   :  { %995 = vmatprep.subr.bf16.mxu1 %v994_v62 }
 0x3ec   :  { %997 = vmatpush3.bf16.msra.mxu1 %v996_v2 }
 0x3ef   :  { %688 = vmatmul.mubr.f32.vlgmr.msra.gmra.mrb[0].mxu1 %v487_v4 }
 0x4b1   :  { %v824_v5 = vpop.f32.mrb[0].mxu0 }
 0x4b2   :  { %v825_v6 = vpop.f32.mrb[1].mxu0 }
 0x4b3   :  { %v826_v8 = vadd.f32 %v825_v6, %v824_v5 }
 0x4b5   :  { %v620_v11 = vadd.f32 0.5, %v826_v8 }
 0x4c2   :  { %v859_v7 = vpop.f32.mrb[0].mxu1 }
 0x4c3   :  { %v860_v9 = vpop.f32.mrb[1].mxu1 }
 0x4c4   :  { %v861_v10 = vadd.f32 %v860_v9, %v859_v7 }
 0x4c6   :  { %v690_v12 = vadd.f32 %v861_v10, %v620_v11 }
 0x4c8   :  { %v998_v13 = vtrunc.f32 %v690_v12 }
 0x4ca   :  { %v999_v14 = vcvt.f32.s32 %v998_v13 }
 0x4cc   :  { %695 = vst.msk [vmem:[%s1466_s7] sm:$0xff] %vm694_vm4, %v999_v14 }
 0x4cd   :  { %700 = vsyncpa [#allocation7], 1 }

</bundles_post_ra>
